<compile_context>
chip_gen: v7x
topology: tpu7x:2x2x1
jax: 0.10.0
libtpu: 0.0.40
codegen_flags: <defaults>
</compile_context>

<pallas_src>
import functools
import numpy as np
import jax
import jax.numpy as jnp
from jax.experimental import pallas as pl
from jax.experimental.pallas import tpu as pltpu


def _round_up(n, m):
    return ((n + m - 1) // m) * m


def _vmem_capacity_bytes():
    try:
        info = pltpu.get_tpu_info()
        cap = getattr(info, "vmem_capacity_bytes", None)
        if cap:
            return int(cap)
    except Exception:
        pass
    return 64 * 1024 * 1024          # conservative (v7x per-TensorCore VMEM)


def _num_tensorcores():
    try:
        dev = jax.devices()[0]
        for attr in ("num_cores", "core_count", "num_tensorcores"):
            v = getattr(dev, attr, None)
            if isinstance(v, int) and v > 0:
                return max(1, min(v, 8))
    except Exception:
        pass
    return 1


# ---------------------------------------------------------------------------
# Fused kernel: input projection + Tc-step leaky-tanh recurrence per grid step
# ---------------------------------------------------------------------------
def _fused_reservoir_kernel(alpha, tc_len, half, x_ref, win_ref, b_ref,
                            what_ref, h0_ref, out_ref, state_ref, u_ref):
    # Re-init the carried state at the start of each batch chunk's time sweep
    # (time is the last, sequential grid axis).
    @pl.when(pl.program_id(1) == 0)
    def _():
        state_ref[...] = h0_ref[...]

    w_in = win_ref[...]                        # (I, Hp)  resident
    w_hat = what_ref[...]                      # (Hp, Hp) resident
    bias = b_ref[...]                          # (1, Hp)  f32

    tc, bc, i_dim = x_ref.shape
    hp = w_hat.shape[1]

    # --- fused input projection for the whole chunk (off the serial path) ---
    x2 = x_ref[...].reshape(tc * bc, i_dim).astype(w_in.dtype)
    u_ref[...] = (jnp.dot(x2, w_in, preferred_element_type=jnp.float32)
                  + bias).reshape(tc, bc, hp)

    one_minus_a = 1.0 - alpha
    w_dt = w_hat.dtype

    # TODO(synk): net_gain_and_bias=True (g*pre + net_b before tanh) not implemented.
    # TODO(synk): optional `mask` argument of forward() not applied (mask=None path).
    # TODO(synk): activations other than 'tanh' (string dispatch) not implemented.
    if half is None:
        # Single dependency chain (small batch tile).
        def step(tau, state):
            pre = u_ref[tau] + jnp.dot(state.astype(w_dt), w_hat,
                                       preferred_element_type=jnp.float32)
            new = one_minus_a * state + alpha * jnp.tanh(pre)
            out_ref[tau] = new.astype(out_ref.dtype)
            return new

        state_ref[...] = jax.lax.fori_loop(0, tc_len, step, state_ref[...],
                                           unroll=True)
    else:
        # Two independent batch sub-chains, interleaved so one chain's EUP
        # tanh / VPU update overlaps the other chain's MXU matmul.
        # TODO(synk): for Hp <= one MXU tile and tiny Bc, drive the MXU with
        # pltpu.matmul_push_rhs / matmul_acc_lhs to keep W_hat^T in the weight
        # registers across timesteps.
        def step(tau, carry):
            s0, s1 = carry
            u_t = u_ref[tau]
            pre0 = u_t[:half] + jnp.dot(s0.astype(w_dt), w_hat,
                                        preferred_element_type=jnp.float32)
            pre1 = u_t[half:] + jnp.dot(s1.astype(w_dt), w_hat,
                                        preferred_element_type=jnp.float32)
            n0 = one_minus_a * s0 + alpha * jnp.tanh(pre0)
            n1 = one_minus_a * s1 + alpha * jnp.tanh(pre1)
            out_ref[tau, :half] = n0.astype(out_ref.dtype)
            out_ref[tau, half:] = n1.astype(out_ref.dtype)
            return (n0, n1)

        s0, s1 = jax.lax.fori_loop(0, tc_len, step,
                                   (state_ref[:half], state_ref[half:]),
                                   unroll=True)
        state_ref[:half] = s0
        state_ref[half:] = s1


# ---------------------------------------------------------------------------
# Tile selection from a per-chip VMEM budget
# ---------------------------------------------------------------------------
def _select_tiles(T, B, I, H, weight_dtype, out_dtype, time_chunk, batch_chunk):
    Hp = _round_up(H, 128)
    wbytes = jnp.dtype(weight_dtype).itemsize
    obytes = jnp.dtype(out_dtype).itemsize

    vmem_cap = _vmem_capacity_bytes()
    budget = int(vmem_cap * 0.7)
    n_cores = _num_tensorcores()

    # ---- batch tile ---------------------------------------------------------
    B8 = max(8, _round_up(B, 8))
    if batch_chunk is not None:
        Bc = max(8, _round_up(int(batch_chunk), 8))
    else:
        # vreg-pressure guard: loop-carried state Bc*Hp*4 <= ~96 KiB.
        cap = max(8, ((96 * 1024) // (4 * Hp)) // 8 * 8)
        cap = min(cap, 256)                       # MXU M-dim sweet spot
        Bc = min(B8, cap)
        if n_cores >= 2 and B8 >= 16:             # v7x: give every TC a chunk
            Bc = min(Bc, _round_up((B8 + n_cores - 1) // n_cores, 8))
        Bc = max(8, (Bc // 8) * 8)
        if Bc >= 16:                              # enable the 2-way interleave
            Bc = _round_up(Bc, 16)
    Bp = _round_up(B8, Bc)

    # ---- time tile from the VMEM budget -------------------------------------
    # TODO(synk): single-buffer the grid-invariant W_in^T / W_hat^T blocks
    # (pipeline_mode=pl.Buffered(1)) to halve resident-weight VMEM on v7x; they
    # are accounted at 2x (default double-buffering) here instead.
    fixed = (2 * (I * Hp + Hp * Hp) * wbytes      # resident weights (x2 buffers)
             + 2 * Hp * 4                         # bias row
             + 2 * Bc * Hp * 4                    # h0 chunk (double-buffered)
             + Bc * Hp * 4)                       # carried-state scratch
    per_t = Bc * (2 * I * 4                       # x chunk (double-buffered)
                  + 2 * Hp * obytes               # out chunk (double-buffered)
                  + Hp * 4)                       # u scratch (single)
    if time_chunk is not None:
        Tc = max(1, int(time_chunk))
    else:
        avail = (budget - fixed) // per_t if budget > fixed else 1
        Tc = max(1, min(16, T, avail))
    Tp = _round_up(T, Tc)

    vmem_needed = fixed + Tc * per_t
    vmem_limit = int(min(0.9 * vmem_cap,
                         max(32 * 2**20, vmem_needed + vmem_needed // 4 + (4 << 20))))
    return Hp, Bc, Bp, Tc, Tp, vmem_limit


# ---------------------------------------------------------------------------
# Public wrapper
# ---------------------------------------------------------------------------
def reservoir_forward(x, w_in, w_hat, b, h0, alpha, *,
                      weight_dtype=jnp.bfloat16, out_dtype=jnp.float32,
                      time_chunk=None, batch_chunk=None):
    """Reservoir forward pass.

    x: [T, B, I]; w_in: [H, I]; w_hat: [H, H]; b: [H]; h0: [B, H]; alpha: leakage.
    Returns all states, shape [T, B, H].
    weight_dtype=bfloat16 (default) runs the MXU in bf16 with f32 accumulation
    and an f32 carried state; pass float32 for strict numerical parity.
    """
    T, B, I = x.shape
    H = w_hat.shape[0]

    Hp, Bc, Bp, Tc, Tp, vmem_limit = _select_tiles(
        T, B, I, H, weight_dtype, out_dtype, time_chunk, batch_chunk)
    n_bc, n_tc = Bp // Bc, Tp // Tc
    half = Bc // 2 if (Bc >= 16 and Bc % 16 == 0) else None

    # Zero padding is exact: padded hidden units stay 0 forever; padded batch
    # rows and trailing timesteps are sliced off below.
    x_p = jnp.pad(x.astype(jnp.float32), ((0, Tp - T), (0, Bp - B), (0, 0)))
    win_t = jnp.pad(jnp.asarray(w_in, jnp.float32),
                    ((0, Hp - H), (0, 0))).T.astype(weight_dtype)         # (I, Hp)
    what_t = jnp.pad(jnp.asarray(w_hat, jnp.float32),
                     ((0, Hp - H), (0, Hp - H))).T.astype(weight_dtype)   # (Hp, Hp)
    bias_row = jnp.pad(jnp.asarray(b, jnp.float32), (0, Hp - H)).reshape(1, Hp)
    h0_p = jnp.pad(jnp.asarray(h0, jnp.float32), ((0, Bp - B), (0, Hp - H)))

    kernel = functools.partial(_fused_reservoir_kernel, float(alpha), Tc, half)

    out_p = pl.pallas_call(
        kernel,
        out_shape=jax.ShapeDtypeStruct((Tp, Bp, Hp), out_dtype),
        grid_spec=pltpu.PrefetchScalarGridSpec(
            num_scalar_prefetch=0,
            grid=(n_bc, n_tc),
            in_specs=[
                pl.BlockSpec((Tc, Bc, I), lambda bc, tc: (tc, bc, 0)),    # x chunk
                pl.BlockSpec((I, Hp), lambda bc, tc: (0, 0)),             # W_in^T
                pl.BlockSpec((1, Hp), lambda bc, tc: (0, 0)),             # bias
                pl.BlockSpec((Hp, Hp), lambda bc, tc: (0, 0)),            # W_hat^T
                pl.BlockSpec((Bc, Hp), lambda bc, tc: (bc, 0)),           # h0 chunk
            ],
            out_specs=pl.BlockSpec((Tc, Bc, Hp), lambda bc, tc: (tc, bc, 0)),
            scratch_shapes=[
                pltpu.VMEM((Bc, Hp), jnp.float32),       # carried state
                pltpu.VMEM((Tc, Bc, Hp), jnp.float32),   # u = x @ W_in^T + b
            ],
        ),
        compiler_params=pltpu.CompilerParams(
            dimension_semantics=("parallel", "arbitrary"),
            vmem_limit_bytes=int(vmem_limit)),
    )(x_p, win_t, bias_row, what_t, h0_p)

    return out_p[:T, :B, :H]


# ---------------------------------------------------------------------------
# Plain-JAX reference mirroring Reservoir._state_comp
# ---------------------------------------------------------------------------
def _reference(x, w_in, w_hat, b, h0, alpha):
    hi = jax.lax.Precision.HIGHEST

    def step(state, x_t):
        pre = (jnp.dot(x_t, w_in.T, precision=hi) + b
               + jnp.dot(state, w_hat.T, precision=hi))
        new = (1.0 - alpha) * state + alpha * jnp.tanh(pre)
        return new, new

    _, ys = jax.lax.scan(step, h0, x)
    return ys


def _snap_bf16(a):
    # Snap test data to bf16-representable values so the comparison is
    # insensitive to which MXU pass mode (bf16 vs f32) each implementation uses.
    return a.astype(jnp.bfloat16).astype(jnp.float32)


def _make_weights(key, I, H, input_scaling, rho):
    k_win, k_what = jax.random.split(key)
    # W_in: uniform in [-1, 1], 'linear' rescale by input_scaling.
    w_in = (jax.random.uniform(k_win, (H, I), minval=-1.0, maxval=1.0)
            * input_scaling).astype(jnp.float32)
    # W_hat: normal init, 'spectral' rescale to spectral radius rho.
    w_raw = jax.random.normal(k_what, (H, H), dtype=jnp.float32)
    sr = float(np.max(np.abs(np.linalg.eigvals(np.asarray(w_raw)))))
    w_hat = (w_raw * (rho / sr)).astype(jnp.float32)
    return _snap_bf16(w_in), _snap_bf16(w_hat)


if __name__ == "__main__":
    input_scaling, rho, alpha = 0.9, 0.99, 0.5

    key = jax.random.PRNGKey(0)
    k1, k2, k3, k4, k5, k6 = jax.random.split(key, 6)

    # --- Test 1: aligned shapes; strict f32-weight path ----------------------
    T, B, I, H = 8, 4, 16, 128
    w_in, w_hat = _make_weights(k1, I, H, input_scaling, rho)
    b = jnp.zeros((H,), jnp.float32)             # module default bias=False
    h0 = jnp.zeros((B, H), jnp.float32)          # default initial_state = zeros
    x = _snap_bf16(jax.random.normal(k2, (T, B, I), dtype=jnp.float32))

    out = jax.block_until_ready(
        reservoir_forward(x, w_in, w_hat, b, h0, alpha, weight_dtype=jnp.float32))
    ref = _reference(x, w_in, w_hat, b, h0, alpha)
    assert out.shape == (T, B, H)
    assert jnp.allclose(out, ref, atol=1e-4, rtol=1e-4), "f32-weight path mismatch"

    # --- Test 1b: default bf16 weights (f32 state / accumulation) ------------
    out_bf = jax.block_until_ready(reservoir_forward(x, w_in, w_hat, b, h0, alpha))
    assert bool(jnp.all(jnp.isfinite(out_bf)))
    assert jnp.allclose(out_bf, ref, atol=1e-1), "bf16-weight path drifted too far"

    # --- Test 2: unaligned T/B/H, explicit chunks, padding on every axis -----
    T2, B2, I2, H2 = 6, 12, 16, 96
    w_in2, w_hat2 = _make_weights(k3, I2, H2, input_scaling, rho)
    b2 = jnp.zeros((H2,), jnp.float32)
    h02 = jnp.zeros((B2, H2), jnp.float32)
    x2 = _snap_bf16(jax.random.normal(k4, (T2, B2, I2), dtype=jnp.float32))

    out2 = jax.block_until_ready(
        reservoir_forward(x2, w_in2, w_hat2, b2, h02, alpha,
                          weight_dtype=jnp.float32, time_chunk=4, batch_chunk=8))
    ref2 = _reference(x2, w_in2, w_hat2, b2, h02, alpha)
    assert out2.shape == (T2, B2, H2)
    assert jnp.allclose(out2, ref2, atol=1e-4, rtol=1e-4), "padded-shape mismatch"

    # --- Test 3: larger batch tile -> interleaved two-chain recurrence -------
    T3, B3, I3, H3 = 5, 24, 16, 128
    w_in3, w_hat3 = _make_weights(k5, I3, H3, input_scaling, rho)
    b3 = jnp.zeros((H3,), jnp.float32)
    h03 = jnp.zeros((B3, H3), jnp.float32)
    x3 = _snap_bf16(jax.random.normal(k6, (T3, B3, I3), dtype=jnp.float32))

    out3 = jax.block_until_ready(
        reservoir_forward(x3, w_in3, w_hat3, b3, h03, alpha,
                          weight_dtype=jnp.float32, batch_chunk=16))
    ref3 = _reference(x3, w_in3, w_hat3, b3, h03, alpha)
    assert out3.shape == (T3, B3, H3)
    assert jnp.allclose(out3, ref3, atol=1e-4, rtol=1e-4), "interleaved path mismatch"

    print("KERNEL_OK")
</pallas_src>

<mosaic_0001>
module attributes {stable_mosaic.version = 11 : i64} {
  func.func @_fused_reservoir_kernel(%arg0: i32, %arg1: i32, %arg2: memref<8x8x16xf32, #tpu.memory_space<vmem>>, %arg3: memref<16x128xf32, #tpu.memory_space<vmem>>, %arg4: memref<1x128xf32, #tpu.memory_space<vmem>>, %arg5: memref<128x128xf32, #tpu.memory_space<vmem>>, %arg6: memref<8x128xf32, #tpu.memory_space<vmem>>, %arg7: memref<8x8x128xf32, #tpu.memory_space<vmem>>, %arg8: memref<8x128xf32, #tpu.memory_space<vmem>>, %arg9: memref<8x8x128xf32, #tpu.memory_space<vmem>>) attributes {dimension_semantics = [#tpu.dimension_semantics<parallel>, #tpu.dimension_semantics<arbitrary>], iteration_bounds = array<i64: 1, 1>, scalar_prefetch = 0 : i64, scratch_operands = 2 : i64, tpu.core_type = #tpu.core_type<tc>, window_params = [{transform_indices = @transform_0, window_bounds = array<i64: 8, 8, 16>}, {pipeline_mode = #tpu.pipeline_mode<synchronous>, transform_indices = @transform_1, window_bounds = array<i64: 16, 128>}, {pipeline_mode = #tpu.pipeline_mode<synchronous>, transform_indices = @transform_2, window_bounds = array<i64: 1, 128>}, {pipeline_mode = #tpu.pipeline_mode<synchronous>, transform_indices = @transform_3, window_bounds = array<i64: 128, 128>}, {transform_indices = @transform_4, window_bounds = array<i64: 8, 128>}, {transform_indices = @transform_5, window_bounds = array<i64: 8, 8, 128>}]} {
    %c0_i32 = arith.constant 0 : i32
    %0 = arith.cmpi eq, %arg1, %c0_i32 : i32
    %1 = arith.extui %0 : i1 to i32
    %c0_i32_0 = arith.constant 0 : i32
    %2 = arith.cmpi ne, %1, %c0_i32_0 : i32
    scf.if %2 {
      %c0_73 = arith.constant 0 : index
      %c0_74 = arith.constant 0 : index
      %135 = vector.load %arg6[%c0_73, %c0_74] : memref<8x128xf32, #tpu.memory_space<vmem>>, vector<8x128xf32>
      %c0_75 = arith.constant 0 : index
      %c0_76 = arith.constant 0 : index
      %136 = vector.load %arg8[%c0_75, %c0_76] : memref<8x128xf32, #tpu.memory_space<vmem>>, vector<8x128xf32>
      tpu.vector_store %arg8[%c0_75, %c0_76], %135 {strides = array<i32>} : memref<8x128xf32, #tpu.memory_space<vmem>>, vector<8x128xf32>,
    } else {
    }
    %c0 = arith.constant 0 : index
    %c0_1 = arith.constant 0 : index
    %3 = vector.load %arg3[%c0, %c0_1] : memref<16x128xf32, #tpu.memory_space<vmem>>, vector<16x128xf32>
    %c0_2 = arith.constant 0 : index
    %c0_3 = arith.constant 0 : index
    %4 = vector.load %arg5[%c0_2, %c0_3] : memref<128x128xf32, #tpu.memory_space<vmem>>, vector<128x128xf32>
    %c0_4 = arith.constant 0 : index
    %c0_5 = arith.constant 0 : index
    %5 = vector.load %arg4[%c0_4, %c0_5] : memref<1x128xf32, #tpu.memory_space<vmem>>, vector<1x128xf32>
    %c0_6 = arith.constant 0 : index
    %c0_7 = arith.constant 0 : index
    %c0_8 = arith.constant 0 : index
    %6 = vector.load %arg2[%c0_6, %c0_7, %c0_8] : memref<8x8x16xf32, #tpu.memory_space<vmem>>, vector<8x8x16xf32>
    %7 = vector.shape_cast %6 : vector<8x8x16xf32> to vector<64x16xf32>
    %cst = arith.constant dense<0.000000e+00> : vector<64x128xf32>
    %8 = tpu.matmul %7, %3, %cst {dimension_numbers = #tpu.dot_dimension_numbers<[1], [0], [0], [1], [0, 0, 1, 1], [], []>} : vector<64x16xf32>, vector<16x128xf32>, vector<64x128xf32> -> vector<64x128xf32>
    %9 = vector.broadcast %5 : vector<1x128xf32> to vector<64x128xf32>
    %10 = arith.addf %8, %9 : vector<64x128xf32>
    %11 = vector.shape_cast %10 : vector<64x128xf32> to vector<8x8x128xf32>
    %c0_9 = arith.constant 0 : index
    %c0_10 = arith.constant 0 : index
    %c0_11 = arith.constant 0 : index
    %12 = vector.load %arg9[%c0_9, %c0_10, %c0_11] : memref<8x8x128xf32, #tpu.memory_space<vmem>>, vector<8x8x128xf32>
    tpu.vector_store %arg9[%c0_9, %c0_10, %c0_11], %11 {strides = array<i32>} : memref<8x8x128xf32, #tpu.memory_space<vmem>>, vector<8x8x128xf32>,
    %c0_12 = arith.constant 0 : index
    %c0_13 = arith.constant 0 : index
    %13 = vector.load %arg8[%c0_12, %c0_13] : memref<8x128xf32, #tpu.memory_space<vmem>>, vector<8x128xf32>
    %c0_i32_14 = arith.constant 0 : i32
    %14 = arith.index_cast %c0_i32_14 : i32 to index
    %c0_15 = arith.constant 0 : index
    %c0_16 = arith.constant 0 : index
    %15 = vector.load %arg9[%14, %c0_15, %c0_16] : memref<8x8x128xf32, #tpu.memory_space<vmem>>, vector<1x8x128xf32>
    %16 = vector.shape_cast %15 : vector<1x8x128xf32> to vector<8x128xf32>
    %cst_17 = arith.constant dense<0.000000e+00> : vector<8x128xf32>
    %17 = tpu.matmul %13, %4, %cst_17 {dimension_numbers = #tpu.dot_dimension_numbers<[1], [0], [0], [1], [0, 0, 1, 1], [], []>} : vector<8x128xf32>, vector<128x128xf32>, vector<8x128xf32> -> vector<8x128xf32>
    %18 = arith.addf %16, %17 : vector<8x128xf32>
    %cst_18 = arith.constant 5.000000e-01 : f32
    %19 = vector.broadcast %cst_18 : f32 to vector<8x128xf32>
    %20 = arith.mulf %19, %13 : vector<8x128xf32>
    %21 = math.tanh %18 : vector<8x128xf32>
    %cst_19 = arith.constant 5.000000e-01 : f32
    %22 = vector.broadcast %cst_19 : f32 to vector<8x128xf32>
    %23 = arith.mulf %22, %21 : vector<8x128xf32>
    %24 = arith.addf %20, %23 : vector<8x128xf32>
    %25 = arith.index_cast %c0_i32_14 : i32 to index
    %c0_20 = arith.constant 0 : index
    %c0_21 = arith.constant 0 : index
    %26 = vector.load %arg7[%25, %c0_20, %c0_21] : memref<8x8x128xf32, #tpu.memory_space<vmem>>, vector<1x8x128xf32>
    %27 = vector.shape_cast %26 : vector<1x8x128xf32> to vector<8x128xf32>
    %28 = vector.shape_cast %24 : vector<8x128xf32> to vector<1x8x128xf32>
    tpu.vector_store %arg7[%25, %c0_20, %c0_21], %28 {strides = array<i32>} : memref<8x8x128xf32, #tpu.memory_space<vmem>>, vector<1x8x128xf32>,
    %c1_i32 = arith.constant 1 : i32
    %29 = arith.index_cast %c1_i32 : i32 to index
    %c0_22 = arith.constant 0 : index
    %c0_23 = arith.constant 0 : index
    %30 = vector.load %arg9[%29, %c0_22, %c0_23] : memref<8x8x128xf32, #tpu.memory_space<vmem>>, vector<1x8x128xf32>
    %31 = vector.shape_cast %30 : vector<1x8x128xf32> to vector<8x128xf32>
    %cst_24 = arith.constant dense<0.000000e+00> : vector<8x128xf32>
    %32 = tpu.matmul %24, %4, %cst_24 {dimension_numbers = #tpu.dot_dimension_numbers<[1], [0], [0], [1], [0, 0, 1, 1], [], []>} : vector<8x128xf32>, vector<128x128xf32>, vector<8x128xf32> -> vector<8x128xf32>
    %33 = arith.addf %31, %32 : vector<8x128xf32>
    %cst_25 = arith.constant 5.000000e-01 : f32
    %34 = vector.broadcast %cst_25 : f32 to vector<8x128xf32>
    %35 = arith.mulf %34, %24 : vector<8x128xf32>
    %36 = math.tanh %33 : vector<8x128xf32>
    %cst_26 = arith.constant 5.000000e-01 : f32
    %37 = vector.broadcast %cst_26 : f32 to vector<8x128xf32>
    %38 = arith.mulf %37, %36 : vector<8x128xf32>
    %39 = arith.addf %35, %38 : vector<8x128xf32>
    %40 = arith.index_cast %c1_i32 : i32 to index
    %c0_27 = arith.constant 0 : index
    %c0_28 = arith.constant 0 : index
    %41 = vector.load %arg7[%40, %c0_27, %c0_28] : memref<8x8x128xf32, #tpu.memory_space<vmem>>, vector<1x8x128xf32>
    %42 = vector.shape_cast %41 : vector<1x8x128xf32> to vector<8x128xf32>
    %43 = vector.shape_cast %39 : vector<8x128xf32> to vector<1x8x128xf32>
    tpu.vector_store %arg7[%40, %c0_27, %c0_28], %43 {strides = array<i32>} : memref<8x8x128xf32, #tpu.memory_space<vmem>>, vector<1x8x128xf32>,
    %c2_i32 = arith.constant 2 : i32
    %44 = arith.index_cast %c2_i32 : i32 to index
    %c0_29 = arith.constant 0 : index
    %c0_30 = arith.constant 0 : index
    %45 = vector.load %arg9[%44, %c0_29, %c0_30] : memref<8x8x128xf32, #tpu.memory_space<vmem>>, vector<1x8x128xf32>
    %46 = vector.shape_cast %45 : vector<1x8x128xf32> to vector<8x128xf32>
    %cst_31 = arith.constant dense<0.000000e+00> : vector<8x128xf32>
    %47 = tpu.matmul %39, %4, %cst_31 {dimension_numbers = #tpu.dot_dimension_numbers<[1], [0], [0], [1], [0, 0, 1, 1], [], []>} : vector<8x128xf32>, vector<128x128xf32>, vector<8x128xf32> -> vector<8x128xf32>
    %48 = arith.addf %46, %47 : vector<8x128xf32>
    %cst_32 = arith.constant 5.000000e-01 : f32
    %49 = vector.broadcast %cst_32 : f32 to vector<8x128xf32>
    %50 = arith.mulf %49, %39 : vector<8x128xf32>
    %51 = math.tanh %48 : vector<8x128xf32>
    %cst_33 = arith.constant 5.000000e-01 : f32
    %52 = vector.broadcast %cst_33 : f32 to vector<8x128xf32>
    %53 = arith.mulf %52, %51 : vector<8x128xf32>
    %54 = arith.addf %50, %53 : vector<8x128xf32>
    %55 = arith.index_cast %c2_i32 : i32 to index
    %c0_34 = arith.constant 0 : index
    %c0_35 = arith.constant 0 : index
    %56 = vector.load %arg7[%55, %c0_34, %c0_35] : memref<8x8x128xf32, #tpu.memory_space<vmem>>, vector<1x8x128xf32>
    %57 = vector.shape_cast %56 : vector<1x8x128xf32> to vector<8x128xf32>
    %58 = vector.shape_cast %54 : vector<8x128xf32> to vector<1x8x128xf32>
    tpu.vector_store %arg7[%55, %c0_34, %c0_35], %58 {strides = array<i32>} : memref<8x8x128xf32, #tpu.memory_space<vmem>>, vector<1x8x128xf32>,
    %c3_i32 = arith.constant 3 : i32
    %59 = arith.index_cast %c3_i32 : i32 to index
    %c0_36 = arith.constant 0 : index
    %c0_37 = arith.constant 0 : index
    %60 = vector.load %arg9[%59, %c0_36, %c0_37] : memref<8x8x128xf32, #tpu.memory_space<vmem>>, vector<1x8x128xf32>
    %61 = vector.shape_cast %60 : vector<1x8x128xf32> to vector<8x128xf32>
    %cst_38 = arith.constant dense<0.000000e+00> : vector<8x128xf32>
    %62 = tpu.matmul %54, %4, %cst_38 {dimension_numbers = #tpu.dot_dimension_numbers<[1], [0], [0], [1], [0, 0, 1, 1], [], []>} : vector<8x128xf32>, vector<128x128xf32>, vector<8x128xf32> -> vector<8x128xf32>
    %63 = arith.addf %61, %62 : vector<8x128xf32>
    %cst_39 = arith.constant 5.000000e-01 : f32
    %64 = vector.broadcast %cst_39 : f32 to vector<8x128xf32>
    %65 = arith.mulf %64, %54 : vector<8x128xf32>
    %66 = math.tanh %63 : vector<8x128xf32>
    %cst_40 = arith.constant 5.000000e-01 : f32
    %67 = vector.broadcast %cst_40 : f32 to vector<8x128xf32>
    %68 = arith.mulf %67, %66 : vector<8x128xf32>
    %69 = arith.addf %65, %68 : vector<8x128xf32>
    %70 = arith.index_cast %c3_i32 : i32 to index
    %c0_41 = arith.constant 0 : index
    %c0_42 = arith.constant 0 : index
    %71 = vector.load %arg7[%70, %c0_41, %c0_42] : memref<8x8x128xf32, #tpu.memory_space<vmem>>, vector<1x8x128xf32>
    %72 = vector.shape_cast %71 : vector<1x8x128xf32> to vector<8x128xf32>
    %73 = vector.shape_cast %69 : vector<8x128xf32> to vector<1x8x128xf32>
    tpu.vector_store %arg7[%70, %c0_41, %c0_42], %73 {strides = array<i32>} : memref<8x8x128xf32, #tpu.memory_space<vmem>>, vector<1x8x128xf32>,
    %c4_i32 = arith.constant 4 : i32
    %74 = arith.index_cast %c4_i32 : i32 to index
    %c0_43 = arith.constant 0 : index
    %c0_44 = arith.constant 0 : index
    %75 = vector.load %arg9[%74, %c0_43, %c0_44] : memref<8x8x128xf32, #tpu.memory_space<vmem>>, vector<1x8x128xf32>
    %76 = vector.shape_cast %75 : vector<1x8x128xf32> to vector<8x128xf32>
    %cst_45 = arith.constant dense<0.000000e+00> : vector<8x128xf32>
    %77 = tpu.matmul %69, %4, %cst_45 {dimension_numbers = #tpu.dot_dimension_numbers<[1], [0], [0], [1], [0, 0, 1, 1], [], []>} : vector<8x128xf32>, vector<128x128xf32>, vector<8x128xf32> -> vector<8x128xf32>
    %78 = arith.addf %76, %77 : vector<8x128xf32>
    %cst_46 = arith.constant 5.000000e-01 : f32
    %79 = vector.broadcast %cst_46 : f32 to vector<8x128xf32>
    %80 = arith.mulf %79, %69 : vector<8x128xf32>
    %81 = math.tanh %78 : vector<8x128xf32>
    %cst_47 = arith.constant 5.000000e-01 : f32
    %82 = vector.broadcast %cst_47 : f32 to vector<8x128xf32>
    %83 = arith.mulf %82, %81 : vector<8x128xf32>
    %84 = arith.addf %80, %83 : vector<8x128xf32>
    %85 = arith.index_cast %c4_i32 : i32 to index
    %c0_48 = arith.constant 0 : index
    %c0_49 = arith.constant 0 : index
    %86 = vector.load %arg7[%85, %c0_48, %c0_49] : memref<8x8x128xf32, #tpu.memory_space<vmem>>, vector<1x8x128xf32>
    %87 = vector.shape_cast %86 : vector<1x8x128xf32> to vector<8x128xf32>
    %88 = vector.shape_cast %84 : vector<8x128xf32> to vector<1x8x128xf32>
    tpu.vector_store %arg7[%85, %c0_48, %c0_49], %88 {strides = array<i32>} : memref<8x8x128xf32, #tpu.memory_space<vmem>>, vector<1x8x128xf32>,
    %c5_i32 = arith.constant 5 : i32
    %89 = arith.index_cast %c5_i32 : i32 to index
    %c0_50 = arith.constant 0 : index
    %c0_51 = arith.constant 0 : index
    %90 = vector.load %arg9[%89, %c0_50, %c0_51] : memref<8x8x128xf32, #tpu.memory_space<vmem>>, vector<1x8x128xf32>
    %91 = vector.shape_cast %90 : vector<1x8x128xf32> to vector<8x128xf32>
    %cst_52 = arith.constant dense<0.000000e+00> : vector<8x128xf32>
    %92 = tpu.matmul %84, %4, %cst_52 {dimension_numbers = #tpu.dot_dimension_numbers<[1], [0], [0], [1], [0, 0, 1, 1], [], []>} : vector<8x128xf32>, vector<128x128xf32>, vector<8x128xf32> -> vector<8x128xf32>
    %93 = arith.addf %91, %92 : vector<8x128xf32>
    %cst_53 = arith.constant 5.000000e-01 : f32
    %94 = vector.broadcast %cst_53 : f32 to vector<8x128xf32>
    %95 = arith.mulf %94, %84 : vector<8x128xf32>
    %96 = math.tanh %93 : vector<8x128xf32>
    %cst_54 = arith.constant 5.000000e-01 : f32
    %97 = vector.broadcast %cst_54 : f32 to vector<8x128xf32>
    %98 = arith.mulf %97, %96 : vector<8x128xf32>
    %99 = arith.addf %95, %98 : vector<8x128xf32>
    %100 = arith.index_cast %c5_i32 : i32 to index
    %c0_55 = arith.constant 0 : index
    %c0_56 = arith.constant 0 : index
    %101 = vector.load %arg7[%100, %c0_55, %c0_56] : memref<8x8x128xf32, #tpu.memory_space<vmem>>, vector<1x8x128xf32>
    %102 = vector.shape_cast %101 : vector<1x8x128xf32> to vector<8x128xf32>
    %103 = vector.shape_cast %99 : vector<8x128xf32> to vector<1x8x128xf32>
    tpu.vector_store %arg7[%100, %c0_55, %c0_56], %103 {strides = array<i32>} : memref<8x8x128xf32, #tpu.memory_space<vmem>>, vector<1x8x128xf32>,
    %c6_i32 = arith.constant 6 : i32
    %104 = arith.index_cast %c6_i32 : i32 to index
    %c0_57 = arith.constant 0 : index
    %c0_58 = arith.constant 0 : index
    %105 = vector.load %arg9[%104, %c0_57, %c0_58] : memref<8x8x128xf32, #tpu.memory_space<vmem>>, vector<1x8x128xf32>
    %106 = vector.shape_cast %105 : vector<1x8x128xf32> to vector<8x128xf32>
    %cst_59 = arith.constant dense<0.000000e+00> : vector<8x128xf32>
    %107 = tpu.matmul %99, %4, %cst_59 {dimension_numbers = #tpu.dot_dimension_numbers<[1], [0], [0], [1], [0, 0, 1, 1], [], []>} : vector<8x128xf32>, vector<128x128xf32>, vector<8x128xf32> -> vector<8x128xf32>
    %108 = arith.addf %106, %107 : vector<8x128xf32>
    %cst_60 = arith.constant 5.000000e-01 : f32
    %109 = vector.broadcast %cst_60 : f32 to vector<8x128xf32>
    %110 = arith.mulf %109, %99 : vector<8x128xf32>
    %111 = math.tanh %108 : vector<8x128xf32>
    %cst_61 = arith.constant 5.000000e-01 : f32
    %112 = vector.broadcast %cst_61 : f32 to vector<8x128xf32>
    %113 = arith.mulf %112, %111 : vector<8x128xf32>
    %114 = arith.addf %110, %113 : vector<8x128xf32>
    %115 = arith.index_cast %c6_i32 : i32 to index
    %c0_62 = arith.constant 0 : index
    %c0_63 = arith.constant 0 : index
    %116 = vector.load %arg7[%115, %c0_62, %c0_63] : memref<8x8x128xf32, #tpu.memory_space<vmem>>, vector<1x8x128xf32>
    %117 = vector.shape_cast %116 : vector<1x8x128xf32> to vector<8x128xf32>
    %118 = vector.shape_cast %114 : vector<8x128xf32> to vector<1x8x128xf32>
    tpu.vector_store %arg7[%115, %c0_62, %c0_63], %118 {strides = array<i32>} : memref<8x8x128xf32, #tpu.memory_space<vmem>>, vector<1x8x128xf32>,
    %c7_i32 = arith.constant 7 : i32
    %119 = arith.index_cast %c7_i32 : i32 to index
    %c0_64 = arith.constant 0 : index
    %c0_65 = arith.constant 0 : index
    %120 = vector.load %arg9[%119, %c0_64, %c0_65] : memref<8x8x128xf32, #tpu.memory_space<vmem>>, vector<1x8x128xf32>
    %121 = vector.shape_cast %120 : vector<1x8x128xf32> to vector<8x128xf32>
    %cst_66 = arith.constant dense<0.000000e+00> : vector<8x128xf32>
    %122 = tpu.matmul %114, %4, %cst_66 {dimension_numbers = #tpu.dot_dimension_numbers<[1], [0], [0], [1], [0, 0, 1, 1], [], []>} : vector<8x128xf32>, vector<128x128xf32>, vector<8x128xf32> -> vector<8x128xf32>
    %123 = arith.addf %121, %122 : vector<8x128xf32>
    %cst_67 = arith.constant 5.000000e-01 : f32
    %124 = vector.broadcast %cst_67 : f32 to vector<8x128xf32>
    %125 = arith.mulf %124, %114 : vector<8x128xf32>
    %126 = math.tanh %123 : vector<8x128xf32>
    %cst_68 = arith.constant 5.000000e-01 : f32
    %127 = vector.broadcast %cst_68 : f32 to vector<8x128xf32>
    %128 = arith.mulf %127, %126 : vector<8x128xf32>
    %129 = arith.addf %125, %128 : vector<8x128xf32>
    %130 = arith.index_cast %c7_i32 : i32 to index
    %c0_69 = arith.constant 0 : index
    %c0_70 = arith.constant 0 : index
    %131 = vector.load %arg7[%130, %c0_69, %c0_70] : memref<8x8x128xf32, #tpu.memory_space<vmem>>, vector<1x8x128xf32>
    %132 = vector.shape_cast %131 : vector<1x8x128xf32> to vector<8x128xf32>
    %133 = vector.shape_cast %129 : vector<8x128xf32> to vector<1x8x128xf32>
    tpu.vector_store %arg7[%130, %c0_69, %c0_70], %133 {strides = array<i32>} : memref<8x8x128xf32, #tpu.memory_space<vmem>>, vector<1x8x128xf32>,
    %c8_i32 = arith.constant 8 : i32
    %c0_71 = arith.constant 0 : index
    %c0_72 = arith.constant 0 : index
    %134 = vector.load %arg8[%c0_71, %c0_72] : memref<8x128xf32, #tpu.memory_space<vmem>>, vector<8x128xf32>
    tpu.vector_store %arg8[%c0_71, %c0_72], %129 {strides = array<i32>} : memref<8x128xf32, #tpu.memory_space<vmem>>, vector<8x128xf32>,
    return
  }
  func.func @transform_0(%arg0: i32, %arg1: i32) -> (i32, i32, i32) {
    %c0_i32 = arith.constant 0 : i32
    %c0_i32_0 = arith.constant 0 : i32
    return %arg1, %arg0, %c0_i32 : i32, i32, i32
  }
  func.func @transform_1(%arg0: i32, %arg1: i32) -> (i32, i32) {
    %c0_i32 = arith.constant 0 : i32
    %c0_i32_0 = arith.constant 0 : i32
    %c0_i32_1 = arith.constant 0 : i32
    return %c0_i32, %c0_i32_0 : i32, i32
  }
  func.func @transform_2(%arg0: i32, %arg1: i32) -> (i32, i32) {
    %c0_i32 = arith.constant 0 : i32
    %c0_i32_0 = arith.constant 0 : i32
    %c0_i32_1 = arith.constant 0 : i32
    return %c0_i32, %c0_i32_0 : i32, i32
  }
  func.func @transform_3(%arg0: i32, %arg1: i32) -> (i32, i32) {
    %c0_i32 = arith.constant 0 : i32
    %c0_i32_0 = arith.constant 0 : i32
    %c0_i32_1 = arith.constant 0 : i32
    return %c0_i32, %c0_i32_0 : i32, i32
  }
  func.func @transform_4(%arg0: i32, %arg1: i32) -> (i32, i32) {
    %c0_i32 = arith.constant 0 : i32
    %c0_i32_0 = arith.constant 0 : i32
    return %arg0, %c0_i32 : i32, i32
  }
  func.func @transform_5(%arg0: i32, %arg1: i32) -> (i32, i32, i32) {
    %c0_i32 = arith.constant 0 : i32
    %c0_i32_0 = arith.constant 0 : i32
    return %arg1, %arg0, %c0_i32 : i32, i32, i32
  }
}

</mosaic_0001>

<bundles_post_ra>
// kernel: tpu_custom_call.1
= control target key start
LH: loop header
LB: loop body
LE: loop exit
PB: predicated region body
PF: predicated region fallthrough
CT: control target
= control target key end

     0   :  { %10 = vsyncpa [#allocation5], 0  ;;  %s1957_s0 = inlined_call_operand.hbm [shape: f32[8,8,16], index: 0, kind: input, shape index: {}]   ;;  %s1958_s1 = inlined_call_operand.hbm [shape: f32[16,128], index: 1, kind: input, shape index: {}]   ;;  %s1959_s2 = inlined_call_operand.vmem [shape: f32[1,128], index: 2, kind: input, shape index: {}]   ;;  %s1960_s3 = inlined_call_operand.hbm [shape: f32[128,128], index: 3, kind: input, shape index: {}]   ;;  %s1961_s4 = inlined_call_operand.vmem [shape: f32[8,128], index: 4, kind: input, shape index: {}]   ;;  %s1962_s5 = inlined_call_operand.hbm [shape: f32[8,8,128], index: 5, kind: output, shape index: {}]  }
   0x1   :  { %11 = vsyncpa [#allocation8], 0 }
   0x2   :  { %12 = vsyncpa [#allocation6], 0  ;;  %s1655_s18 = smov [#allocation7]   ;;  %s1656_s20 = smov [#allocation4]  }
   0x3   :  { %s30_s19 = sshll.u32 %s1655_s18, 4  ;;  %s18_s21 = sshll.u32 %s1656_s20, 4  ;;  %s31_s19 = int_to_ptr.vmem [resolvable:$true] %s30_s19  ;;  %s1694_s21 = int_to_ptr.vmem [resolvable:$true] %s18_s21 }
   0x4   :  { %s1561_s24 = scalar_lea.hbm %s1958_s1, 256 }
   0x5   :  { %p1562_p0 = scmp.ne.s32.totalorder %s1958_s1, %s1561_s24  ;;  %p1565_p1 = scmp.lt.u32.totalorder %s1561_s24, %s1958_s1 }
   0x7   :  { %p1567_p2 = pnand %p1565_p1, %p1562_p0 }
   0x9   :  { %1570 = shalt.err (!%p1567_p2)
}
   0xa   :  { %s1571_s29 = scalar_lea.vmem %s31_s19, 256  ;;  %p1576_p4 = scmp.lt.s32.totalorder %s31_s19, %s31_s19 }
   0xb   :  { %p1572_p3 = scmp.ne.s32.totalorder %s31_s19, %s1571_s29  ;;  %p1577_p5 = scmp.lt.s32.totalorder %s1571_s29, %s1571_s29 }
   0xd   :  { %p1578_p6 = por %p1577_p5, %p1576_p4 }
   0xf   :  { %p1579_p7 = pnand %p1578_p6, %p1572_p3 }
  0x11   :  { %1582 = shalt.err (!%p1579_p7)
}
  0x12   :  { %s1657_s30 = smov 128   ;;  %s1658_s6 = smov 8  }
  0x13   :  { %36 = dma.hbm_to_vmem [thread:$0]  %s1958_s1, 256, %s31_s19, [#allocation8], %s1657_s30, %s1657_s30, %s1658_s6  }
  0x14   :  { %s1583_s11 = scalar_lea.hbm %s1957_s0, 1024 }
  0x15   :  { %p1584_p8 = scmp.ne.s32.totalorder %s1957_s0, %s1583_s11  ;;  %p1587_p9 = scmp.lt.u32.totalorder %s1583_s11, %s1957_s0 }
  0x17   :  { %p1589_p10 = pnand %p1587_p9, %p1584_p8 }
  0x19   :  { %1592 = shalt.err (!%p1589_p10)
}
  0x1a   :  { %s1593_s16 = scalar_lea.vmem %s1694_s21, 1024  ;;  %p1598_p12 = scmp.lt.s32.totalorder %s1694_s21, %s1694_s21 }
  0x1b   :  { %p1594_p11 = scmp.ne.s32.totalorder %s1694_s21, %s1593_s16  ;;  %p1599_p13 = scmp.lt.s32.totalorder %s1593_s16, %s1593_s16 }
  0x1d   :  { %p1600_p0 = por %p1599_p13, %p1598_p12 }
  0x1f   :  { %p1601_p1 = pnand %p1600_p0, %p1594_p11 }
  0x21   :  { %1604 = shalt.err (!%p1601_p1)
}
  0x22   :  { %24 = dma.hbm_to_vmem [thread:$0]  %s1957_s0, 1024, %s1694_s21, [#allocation5], %s1657_s30, %s1657_s30, %s1658_s6  }
  0x23   :  { %s1659_s18 = smov [#allocation9]   ;;  %s1605_s23 = scalar_lea.hbm %s1960_s3, 2048 }
  0x24   :  { %s44_s19 = sshll.u32 %s1659_s18, 4  ;;  %p1606_p2 = scmp.ne.s32.totalorder %s1960_s3, %s1605_s23  ;;  %s45_s19 = int_to_ptr.vmem [resolvable:$true] %s44_s19 }
  0x25   :  { %p1609_p3 = scmp.lt.u32.totalorder %s1605_s23, %s1960_s3 }
  0x27   :  { %p1611_p4 = pnand %p1609_p3, %p1606_p2 }
  0x29   :  { %1614 = shalt.err (!%p1611_p4)
}
  0x2a   :  { %s1615_s28 = scalar_lea.vmem %s45_s19, 2048  ;;  %p1620_p6 = scmp.lt.s32.totalorder %s45_s19, %s45_s19 }
  0x2b   :  { %p1616_p5 = scmp.ne.s32.totalorder %s45_s19, %s1615_s28  ;;  %p1621_p7 = scmp.lt.s32.totalorder %s1615_s28, %s1615_s28 }
  0x2d   :  { %p1622_p8 = por %p1621_p7, %p1620_p6 }
  0x2f   :  { %p1623_p9 = pnand %p1622_p8, %p1616_p5 }
  0x31   :  { %1626 = shalt.err (!%p1623_p9)
}
  0x32   :  { %50 = dma.hbm_to_vmem [thread:$0]  %s1960_s3, 2048, %s45_s19, [#allocation8], %s1657_s30, %s1657_s30, %s1658_s6  }
  0x33   :  { %1649 = dma.done.wait [#allocation5], 1024  }
  0x34   :  { %1650 = vsyncadd [#allocation5], 4294966272 }
  0x35   :  { %1651 = dma.done.wait [#allocation8], 2304  }
  0x36   :  { %1652 = vsyncadd [#allocation8], 4294964992  ;;  %v1660_v0 = vmov 0.0|0.0   ;;  %vm1661_vm0 = vmmov 0   ;;  %v1662_v1 = vmov 0.0   ;;  %v70_v2 = vld [vmem:[#allocation9] sm:$0xff] }
  0x37   :  { %1344 = vmatprep.subr.bf16.mxu1 %v1660_v0  ;;  %1092 = vmatprep.mubr.msk.f32.mxu1 %vm1661_vm0, %v1662_v1  ;;  %v71_v3 = vld [vmem:[#allocation9 + $0x8] sm:$0xff]  ;;  %v72_v4 = vld [vmem:[#allocation9 + $0x10] sm:$0xff]  ;;  %v73_v6 = vld [vmem:[#allocation9 + $0x18] sm:$0xff]  ;;  %vm101_vm1 = vcmask 130048  }
  0x38   :  { %v1749_v5 = vpack.c.bf16 %v71_v3, %v70_v2  ;;  %v1752_v7 = vpack.c.bf16 %v73_v6, %v72_v4  ;;  %v74_v8 = vld [vmem:[#allocation9 + $0x20] sm:$0xff]  ;;  %v75_v9 = vld [vmem:[#allocation9 + $0x28] sm:$0xff]  ;;  %v68_v10 = vld [vmem:[#allocation7] sm:$0xff] }
  0x39   :  { %v69_v11 = vld [vmem:[#allocation7 + $0x8] sm:$0xff]  ;;  %v87_v13 = vld [vmem:[#allocation4] sm:$0xff]  ;;  %v1757_v14 = vpack.c.bf16 %v75_v9, %v74_v8  ;;  %v78_v19 = vld [vmem:[#allocation9 + $0x40] sm:$0xff] }
  0x3a   :  { %1346 = vmatpush3.bf16.msra.mxu1 %v1749_v5  ;;  %v1340_v12 = vpack.c.bf16 %v69_v11, %v68_v10  ;;  %1048 = vmatprep.mubr.msk.f32.mxu0 %vm101_vm1, %v87_v13  ;;  %v76_v15 = vld [vmem:[#allocation9 + $0x30] sm:$0xff]  ;;  %v77_v16 = vld [vmem:[#allocation9 + $0x38] sm:$0xff]  ;;  %v79_v20 = vld [vmem:[#allocation9 + $0x48] sm:$0xff] }
  0x3b   :  { %1347 = vmatprep.subr.bf16.mxu1 %v1660_v0  ;;  %v88_v17 = vld [vmem:[#allocation4 + $0x8] sm:$0xff]  ;;  %v1762_v18 = vpack.c.bf16 %v77_v16, %v76_v15  ;;  %v1769_v21 = vpack.c.bf16 %v79_v20, %v78_v19  ;;  %v80_v22 = vld [vmem:[#allocation9 + $0x50] sm:$0xff]  ;;  %v82_v25 = vld [vmem:[#allocation9 + $0x60] sm:$0xff] }
  0x3c   :  { %1341 = vmatprep.subr.bf16.mxu0 %v1340_v12  ;;  %v81_v23 = vld [vmem:[#allocation9 + $0x58] sm:$0xff]  ;;  %v83_v26 = vld [vmem:[#allocation9 + $0x68] sm:$0xff]  ;;  %v84_v28 = vld [vmem:[#allocation9 + $0x70] sm:$0xff] }
  0x3d   :  { %1343 = vmatpush3.bf16.msra.mxu0 %v1340_v12  ;;  %v1775_v24 = vpack.c.bf16 %v81_v23, %v80_v22  ;;  %v1781_v27 = vpack.c.bf16 %v83_v26, %v82_v25  ;;  %v85_v29 = vld [vmem:[#allocation9 + $0x78] sm:$0xff]  ;;  %v66_v31 = vld [vmem:[%s1961_s4] sm:$0xff]  ;;  %v89_v32 = vld [vmem:[#allocation4 + $0x10] sm:$0xff] }
  0x3e   :  { %1349 = vmatpush3.bf16.msra.mxu1 %v1752_v7  ;;  %1368 = vmatprep.subr.bf16.mxu0 %v1660_v0  ;;  %v1787_v30 = vpack.c.bf16 %v85_v29, %v84_v28  ;;  %v90_v33 = vld [vmem:[#allocation4 + $0x18] sm:$0xff]  ;;  %v91_v34 = vld [vmem:[#allocation4 + $0x20] sm:$0xff]  ;;  %v92_v35 = vld [vmem:[#allocation4 + $0x28] sm:$0xff]  ;;  %v312_v45 = vmul.f32 0.5, %v66_v31 }
  0x3f   :  { %1350 = vmatprep.subr.bf16.mxu1 %v1660_v0  ;;  %v93_v36 = vld [vmem:[#allocation4 + $0x30] sm:$0xff]  ;;  %v94_v37 = vld [vmem:[#allocation4 + $0x38] sm:$0xff]  ;;  %v1832_v40 = vld [vmem:[%s1959_s2] ss:$0 sm:$0xff]  ;;  %s1663_s2 = smov [#allocation10]  }
  0x40   :  { %1049 = vmatmul.mubr.msk.f32.vlgmr.msra.gmra.mrb[0].mxu0 %vm101_vm1, %v88_v17  ;;  %s876_s8 = sshll.u32 %s1663_s2, 4  ;;  %s877_s8 = int_to_ptr.vmem [resolvable:$true] %s876_s8 }
  0x41   :  { %1370 = vmatpush3.bf16.msra.mxu0 %v1749_v5  ;;  %1051 = vmatprep.mubr.msk.f32.mxu0 %vm101_vm1, %v89_v32  ;;  %s1627_s9 = scalar_lea.vmem %s877_s8, 1024  ;;  %p1632_p11 = scmp.lt.s32.totalorder %s877_s8, %s877_s8 }
  0x42   :  { %1352 = vmatpush3.bf16.msra.mxu1 %v1757_v14  ;;  %1371 = vmatprep.subr.bf16.mxu0 %v1660_v0  ;;  %p1628_p10 = scmp.ne.s32.totalorder %s877_s8, %s1627_s9  ;;  %p1633_p12 = scmp.lt.s32.totalorder %s1627_s9, %s1627_s9 }
  0x43   :  { %1353 = vmatprep.subr.bf16.mxu1 %v1660_v0 }
  0x44   :  { %1052 = vmatmul.mubr.msk.f32.gmra.mrb[2].mxu0 %vm101_vm1, %v90_v33  ;;  %p1634_p13 = por %p1633_p12, %p1632_p11 }
  0x45   :  { %1373 = vmatpush3.bf16.msra.mxu0 %v1752_v7  ;;  %1054 = vmatprep.mubr.msk.f32.mxu0 %vm101_vm1, %v91_v34 }
  0x46   :  { %1355 = vmatpush3.bf16.msra.mxu1 %v1762_v18  ;;  %1374 = vmatprep.subr.bf16.mxu0 %v1660_v0  ;;  %p1635_p0 = pnand %p1634_p13, %p1628_p10 }
  0x47   :  { %1356 = vmatprep.subr.bf16.mxu1 %v1660_v0 }
  0x48   :  { %1055 = vmatmul.mubr.msk.f32.gmra.mrb[4].mxu0 %vm101_vm1, %v92_v35 }
  0x49   :  { %1376 = vmatpush3.bf16.msra.mxu0 %v1757_v14  ;;  %1057 = vmatprep.mubr.msk.f32.mxu0 %vm101_vm1, %v93_v36 }
  0x4a   :  { %1358 = vmatpush3.bf16.msra.mxu1 %v1769_v21  ;;  %1377 = vmatprep.subr.bf16.mxu0 %v1660_v0 }
  0x4b   :  { %1359 = vmatprep.subr.bf16.mxu1 %v1660_v0 }
  0x4c   :  { %1058 = vmatmul.mubr.msk.f32.gmra.mrb[6].mxu0 %vm101_vm1, %v94_v37 }
  0x4d   :  { %1379 = vmatpush3.bf16.msra.mxu0 %v1762_v18  ;;  %1127 = vmatprep.mubr.msk.f32.mxu0 %vm1661_vm0, %v1662_v1 }
  0x4e   :  { %1361 = vmatpush3.bf16.msra.mxu1 %v1775_v24  ;;  %1380 = vmatprep.subr.bf16.mxu0 %v1660_v0 }
  0x4f   :  { %1362 = vmatprep.subr.bf16.mxu1 %v1660_v0 }
  0x51   :  { %1382 = vmatpush3.bf16.msra.mxu0 %v1769_v21 }
  0x52   :  { %1364 = vmatpush3.bf16.msra.mxu1 %v1781_v27  ;;  %1383 = vmatprep.subr.bf16.mxu0 %v1660_v0 }
  0x53   :  { %1365 = vmatprep.subr.bf16.mxu1 %v1660_v0 }
  0x55   :  { %1385 = vmatpush3.bf16.msra.mxu0 %v1775_v24 }
  0x56   :  { %1367 = vmatpush3.bf16.msra.mxu1 %v1787_v30  ;;  %1386 = vmatprep.subr.bf16.mxu0 %v1660_v0 }
  0x57   :  { %1392 = vmatprep.subr.bf16.mxu1 %v1660_v0 }
  0x59   :  { %1093 = vmatmul.mubr.f32.vlgmr.msra.gmra.mrb[0].mxu1 %v66_v31  ;;  %1388 = vmatpush3.bf16.msra.mxu0 %v1781_v27 }
  0x5a   :  { %1394 = vmatpush3.bf16.msra.mxu1 %v1749_v5  ;;  %1162 = vmatprep.mubr.msk.f32.mxu1 %vm1661_vm0, %v1662_v1 }
  0x5b   :  { %1395 = vmatprep.subr.bf16.mxu1 %v1660_v0  ;;  %1389 = vmatprep.subr.bf16.mxu0 %v1660_v0 }
  0x5d   :  { %1391 = vmatpush3.bf16.msra.mxu0 %v1787_v30 }
  0x5e   :  { %1397 = vmatpush3.bf16.msra.mxu1 %v1752_v7  ;;  %1416 = vmatprep.subr.bf16.mxu0 %v1660_v0 }
  0x5f   :  { %1398 = vmatprep.subr.bf16.mxu1 %v1660_v0 }
  0x62   :  { %1400 = vmatpush3.bf16.msra.mxu1 %v1757_v14 }
  0x63   :  { %1401 = vmatprep.subr.bf16.mxu1 %v1660_v0 }
  0x66   :  { %1403 = vmatpush3.bf16.msra.mxu1 %v1762_v18 }
  0x67   :  { %1404 = vmatprep.subr.bf16.mxu1 %v1660_v0 }
  0x6a   :  { %1406 = vmatpush3.bf16.msra.mxu1 %v1769_v21 }
  0x6b   :  { %1407 = vmatprep.subr.bf16.mxu1 %v1660_v0 }
  0x6e   :  { %1409 = vmatpush3.bf16.msra.mxu1 %v1775_v24 }
  0x6f   :  { %1410 = vmatprep.subr.bf16.mxu1 %v1660_v0 }
  0x72   :  { %1412 = vmatpush3.bf16.msra.mxu1 %v1781_v27 }
  0x73   :  { %1413 = vmatprep.subr.bf16.mxu1 %v1660_v0 }
  0x76   :  { %1415 = vmatpush3.bf16.msra.mxu1 %v1787_v30 }
  0x77   :  { %1440 = vmatprep.subr.bf16.mxu1 %v1660_v0 }
 0x113   :  { %v1050_v38 = vpop.f32.mrb[0].mxu0 }
 0x114   :  { %v192_v39 = vpop.f32.mrb[1].mxu0  ;;  %v198_v55 = vadd.f32 %v1050_v38, %v1832_v40 }
 0x115   :  { %v193_v41 = vadd.f32 %v1832_v40, %v192_v39 }
 0x117   :  { %v1053_v49 = vpop.f32.mrb[2].mxu0 }
 0x118   :  { %v202_v50 = vpop.f32.mrb[3].mxu0  ;;  %v208_v11 = vadd.f32 %v1053_v49, %v1832_v40 }
 0x119   :  { %v203_v63 = vadd.f32 %v1832_v40, %v202_v50 }
 0x11b   :  { %v1853_v51 = vpop.f32.mrb[4].mxu0 }
 0x11c   :  { %v1855_v52 = vpop.f32.mrb[5].mxu0 }
 0x11d   :  { %v213_v22 = vadd.f32 %v1832_v40, %v1855_v52 }
 0x11f   :  { %v1857_v53 = vpop.f32.mrb[6].mxu0 }
 0x120   :  { %v1859_v54 = vpop.f32.mrb[7].mxu0  ;;  %v228_v39 = vadd.f32 %v1857_v53, %v1832_v40 }
 0x12c   :  { %v307_v42 = vpop.f32.mrb[0].mxu1 }
 0x12d   :  { %v311_v43 = vadd.f32 %v307_v42, %v193_v41  ;;  %v1094_v44 = vpop.f32.mrb[1].mxu1 }
 0x12f   :  { %1545 = vtanh.f32 %v311_v43 }
 0x139   :  { %v1546_v46 = vpop.eup %1545 }
 0x13a   :  { %v314_v47 = vmul.f32 0.5, %v1546_v46 }
 0x13c   :  { %v315_v48 = vadd.f32 %v314_v47, %v312_v45 }
 0x13e   :  { %316 = vst [vmem:[#allocation10] sm:$0xff] %v315_v48  ;;  %1128 = vmatmul.mubr.f32.vlgmr.msra.gmra.mrb[8].mxu0 %v315_v48  ;;  %v390_v60 = vmul.f32 0.5, %v315_v48 }
 0x13f   :  { %1418 = vmatpush3.bf16.msra.mxu0 %v1749_v5  ;;  %1197 = vmatprep.mubr.msk.f32.mxu0 %vm1661_vm0, %v1662_v1 }
 0x140   :  { %1419 = vmatprep.subr.bf16.mxu0 %v1660_v0 }
 0x143   :  { %1421 = vmatpush3.bf16.msra.mxu0 %v1752_v7 }
 0x144   :  { %1422 = vmatprep.subr.bf16.mxu0 %v1660_v0 }
 0x147   :  { %1424 = vmatpush3.bf16.msra.mxu0 %v1757_v14 }
 0x148   :  { %1425 = vmatprep.subr.bf16.mxu0 %v1660_v0 }
 0x14b   :  { %1427 = vmatpush3.bf16.msra.mxu0 %v1762_v18 }
 0x14c   :  { %1428 = vmatprep.subr.bf16.mxu0 %v1660_v0 }
 0x14f   :  { %1430 = vmatpush3.bf16.msra.mxu0 %v1769_v21 }
 0x150   :  { %1431 = vmatprep.subr.bf16.mxu0 %v1660_v0 }
 0x153   :  { %1433 = vmatpush3.bf16.msra.mxu0 %v1775_v24 }
 0x154   :  { %1434 = vmatprep.subr.bf16.mxu0 %v1660_v0 }
 0x157   :  { %1436 = vmatpush3.bf16.msra.mxu0 %v1781_v27 }
 0x158   :  { %1437 = vmatprep.subr.bf16.mxu0 %v1660_v0 }
 0x15b   :  { %1439 = vmatpush3.bf16.msra.mxu0 %v1787_v30 }
 0x15c   :  { %1464 = vmatprep.subr.bf16.mxu0 %v1660_v0 }
 0x211   :  { %v385_v56 = vpop.f32.mrb[8].mxu0 }
 0x212   :  { %v389_v57 = vadd.f32 %v385_v56, %v198_v55  ;;  %v1129_v58 = vpop.f32.mrb[9].mxu0 }
 0x214   :  { %1547 = vtanh.f32 %v389_v57 }
 0x21e   :  { %v1548_v59 = vpop.eup %1547 }
 0x21f   :  { %v392_v61 = vmul.f32 0.5, %v1548_v59 }
 0x221   :  { %v393_v62 = vadd.f32 %v392_v61, %v390_v60 }
 0x223   :  { %395 = vst [vmem:[#allocation10 + $0x8] sm:$0xff] %v393_v62  ;;  %1163 = vmatmul.mubr.f32.vlgmr.msra.gmra.mrb[2].mxu1 %v393_v62  ;;  %v469_v8 = vmul.f32 0.5, %v393_v62 }
 0x224   :  { %1442 = vmatpush3.bf16.msra.mxu1 %v1749_v5  ;;  %1232 = vmatprep.mubr.msk.f32.mxu1 %vm1661_vm0, %v1662_v1 }
 0x225   :  { %1443 = vmatprep.subr.bf16.mxu1 %v1660_v0 }
 0x228   :  { %1445 = vmatpush3.bf16.msra.mxu1 %v1752_v7 }
 0x229   :  { %1446 = vmatprep.subr.bf16.mxu1 %v1660_v0 }
 0x22c   :  { %1448 = vmatpush3.bf16.msra.mxu1 %v1757_v14 }
 0x22d   :  { %1449 = vmatprep.subr.bf16.mxu1 %v1660_v0 }
 0x230   :  { %1451 = vmatpush3.bf16.msra.mxu1 %v1762_v18 }
 0x231   :  { %1452 = vmatprep.subr.bf16.mxu1 %v1660_v0 }
 0x234   :  { %1454 = vmatpush3.bf16.msra.mxu1 %v1769_v21 }
 0x235   :  { %1455 = vmatprep.subr.bf16.mxu1 %v1660_v0 }
 0x238   :  { %1457 = vmatpush3.bf16.msra.mxu1 %v1775_v24 }
 0x239   :  { %1458 = vmatprep.subr.bf16.mxu1 %v1660_v0 }
 0x23c   :  { %1460 = vmatpush3.bf16.msra.mxu1 %v1781_v27 }
 0x23d   :  { %1461 = vmatprep.subr.bf16.mxu1 %v1660_v0 }
 0x240   :  { %1463 = vmatpush3.bf16.msra.mxu1 %v1787_v30 }
 0x241   :  { %1488 = vmatprep.subr.bf16.mxu1 %v1660_v0 }
 0x2f6   :  { %v464_v2 = vpop.f32.mrb[2].mxu1 }
 0x2f7   :  { %v468_v3 = vadd.f32 %v464_v2, %v203_v63  ;;  %v1164_v4 = vpop.f32.mrb[3].mxu1 }
 0x2f9   :  { %1549 = vtanh.f32 %v468_v3 }
 0x303   :  { %v1550_v6 = vpop.eup %1549 }
 0x304   :  { %v471_v9 = vmul.f32 0.5, %v1550_v6 }
 0x306   :  { %v472_v10 = vadd.f32 %v471_v9, %v469_v8 }
 0x308   :  { %474 = vst [vmem:[#allocation10 + $0x10] sm:$0xff] %v472_v10  ;;  %1198 = vmatmul.mubr.f32.vlgmr.msra.gmra.mrb[10].mxu0 %v472_v10  ;;  %v548_v17 = vmul.f32 0.5, %v472_v10 }
 0x309   :  { %1466 = vmatpush3.bf16.msra.mxu0 %v1749_v5  ;;  %1267 = vmatprep.mubr.msk.f32.mxu0 %vm1661_vm0, %v1662_v1 }
 0x30a   :  { %1467 = vmatprep.subr.bf16.mxu0 %v1660_v0 }
 0x30d   :  { %1469 = vmatpush3.bf16.msra.mxu0 %v1752_v7 }
 0x30e   :  { %1470 = vmatprep.subr.bf16.mxu0 %v1660_v0 }
 0x311   :  { %1472 = vmatpush3.bf16.msra.mxu0 %v1757_v14 }
 0x312   :  { %1473 = vmatprep.subr.bf16.mxu0 %v1660_v0 }
 0x315   :  { %1475 = vmatpush3.bf16.msra.mxu0 %v1762_v18 }
 0x316   :  { %1476 = vmatprep.subr.bf16.mxu0 %v1660_v0 }
 0x319   :  { %1478 = vmatpush3.bf16.msra.mxu0 %v1769_v21 }
 0x31a   :  { %1479 = vmatprep.subr.bf16.mxu0 %v1660_v0 }
 0x31d   :  { %1481 = vmatpush3.bf16.msra.mxu0 %v1775_v24 }
 0x31e   :  { %1482 = vmatprep.subr.bf16.mxu0 %v1660_v0 }
 0x321   :  { %1484 = vmatpush3.bf16.msra.mxu0 %v1781_v27 }
 0x322   :  { %1485 = vmatprep.subr.bf16.mxu0 %v1660_v0 }
 0x325   :  { %1487 = vmatpush3.bf16.msra.mxu0 %v1787_v30 }
 0x326   :  { %1512 = vmatprep.subr.bf16.mxu0 %v1660_v0 }
 0x3db   :  { %v543_v12 = vpop.f32.mrb[10].mxu0 }
 0x3dc   :  { %v547_v13 = vadd.f32 %v543_v12, %v208_v11  ;;  %v1199_v15 = vpop.f32.mrb[11].mxu0 }
 0x3de   :  { %1551 = vtanh.f32 %v547_v13 }
 0x3e8   :  { %v1552_v16 = vpop.eup %1551 }
 0x3e9   :  { %v550_v19 = vmul.f32 0.5, %v1552_v16 }
 0x3eb   :  { %v551_v20 = vadd.f32 %v550_v19, %v548_v17 }
 0x3ed   :  { %553 = vst [vmem:[#allocation10 + $0x18] sm:$0xff] %v551_v20  ;;  %1233 = vmatmul.mubr.f32.vlgmr.msra.gmra.mrb[4].mxu1 %v551_v20  ;;  %v627_v29 = vmul.f32 0.5, %v551_v20 }
 0x3ee   :  { %1490 = vmatpush3.bf16.msra.mxu1 %v1749_v5  ;;  %1302 = vmatprep.mubr.msk.f32.mxu1 %vm1661_vm0, %v1662_v1 }
 0x3ef   :  { %1491 = vmatprep.subr.bf16.mxu1 %v1660_v0 }
 0x3f2   :  { %1493 = vmatpush3.bf16.msra.mxu1 %v1752_v7 }
 0x3f3   :  { %1494 = vmatprep.subr.bf16.mxu1 %v1660_v0 }
 0x3f6   :  { %1496 = vmatpush3.bf16.msra.mxu1 %v1757_v14 }
 0x3f7   :  { %1497 = vmatprep.subr.bf16.mxu1 %v1660_v0 }
 0x3fa   :  { %1499 = vmatpush3.bf16.msra.mxu1 %v1762_v18 }
 0x3fb   :  { %1500 = vmatprep.subr.bf16.mxu1 %v1660_v0 }
 0x3fe   :  { %1502 = vmatpush3.bf16.msra.mxu1 %v1769_v21 }
 0x3ff   :  { %1503 = vmatprep.subr.bf16.mxu1 %v1660_v0 }
 0x402   :  { %1505 = vmatpush3.bf16.msra.mxu1 %v1775_v24 }
 0x403   :  { %1506 = vmatprep.subr.bf16.mxu1 %v1660_v0 }
 0x406   :  { %1508 = vmatpush3.bf16.msra.mxu1 %v1781_v27 }
 0x407   :  { %1509 = vmatprep.subr.bf16.mxu1 %v1660_v0 }
 0x40a   :  { %1511 = vmatpush3.bf16.msra.mxu1 %v1787_v30 }
 0x4c0   :  { %v622_v23 = vpop.f32.mrb[4].mxu1 }
 0x4c1   :  { %v626_v25 = vadd.f32 %v622_v23, %v213_v22  ;;  %v1234_v26 = vpop.f32.mrb[5].mxu1 }
 0x4c3   :  { %1553 = vtanh.f32 %v626_v25 }
 0x4cd   :  { %v1554_v28 = vpop.eup %1553 }
 0x4ce   :  { %v629_v31 = vmul.f32 0.5, %v1554_v28 }
 0x4d0   :  { %v630_v32 = vadd.f32 %v629_v31, %v627_v29 }
 0x4d2   :  { %632 = vst [vmem:[#allocation10 + $0x20] sm:$0xff] %v630_v32  ;;  %1268 = vmatmul.mubr.f32.vlgmr.msra.gmra.mrb[12].mxu0 %v630_v32 }
 0x4d3   :  { %1514 = vmatpush3.bf16.msra.mxu0 %v1749_v5  ;;  %1337 = vmatprep.mubr.msk.f32.mxu0 %vm1661_vm0, %v1662_v1  ;;  %v218_v1 = vadd.f32 %v1853_v51, %v1832_v40 }
 0x4d4   :  { %1515 = vmatprep.subr.bf16.mxu0 %v1660_v0 }
 0x4d7   :  { %1517 = vmatpush3.bf16.msra.mxu0 %v1752_v7 }
 0x4d8   :  { %1518 = vmatprep.subr.bf16.mxu0 %v1660_v0 }
 0x4db   :  { %1520 = vmatpush3.bf16.msra.mxu0 %v1757_v14 }
 0x4dc   :  { %1521 = vmatprep.subr.bf16.mxu0 %v1660_v0 }
 0x4df   :  { %1523 = vmatpush3.bf16.msra.mxu0 %v1762_v18 }
 0x4e0   :  { %1524 = vmatprep.subr.bf16.mxu0 %v1660_v0 }
 0x4e3   :  { %1526 = vmatpush3.bf16.msra.mxu0 %v1769_v21  ;;  %v706_v21 = vmul.f32 0.5, %v630_v32 }
 0x4e4   :  { %1527 = vmatprep.subr.bf16.mxu0 %v1660_v0 }
 0x4e7   :  { %1529 = vmatpush3.bf16.msra.mxu0 %v1775_v24  ;;  %v223_v24 = vadd.f32 %v1832_v40, %v1859_v54 }
 0x4e8   :  { %1530 = vmatprep.subr.bf16.mxu0 %v1660_v0 }
 0x4eb   :  { %1532 = vmatpush3.bf16.msra.mxu0 %v1781_v27 }
 0x4ec   :  { %1533 = vmatprep.subr.bf16.mxu0 %v1660_v0 }
 0x4ef   :  { %1535 = vmatpush3.bf16.msra.mxu0 %v1787_v30 }
 0x5a5   :  { %v701_v5 = vpop.f32.mrb[12].mxu0 }
 0x5a6   :  { %v705_v7 = vadd.f32 %v701_v5, %v218_v1  ;;  %v1269_v14 = vpop.f32.mrb[13].mxu0 }
 0x5a8   :  { %1555 = vtanh.f32 %v705_v7 }
 0x5b2   :  { %v1556_v18 = vpop.eup %1555 }
 0x5b3   :  { %v708_v33 = vmul.f32 0.5, %v1556_v18 }
 0x5b5   :  { %v709_v34 = vadd.f32 %v708_v33, %v706_v21 }
 0x5b7   :  { %711 = vst [vmem:[#allocation10 + $0x28] sm:$0xff] %v709_v34  ;;  %1303 = vmatmul.mubr.f32.vlgmr.msra.gmra.mrb[6].mxu1 %v709_v34  ;;  %v785_v36 = vmul.f32 0.5, %v709_v34 }
 0x68a   :  { %v780_v27 = vpop.f32.mrb[6].mxu1 }
 0x68b   :  { %v784_v0 = vadd.f32 %v780_v27, %v223_v24  ;;  %v1304_v35 = vpop.f32.mrb[7].mxu1 }
 0x68d   :  { %1557 = vtanh.f32 %v784_v0 }
 0x697   :  { %v1558_v30 = vpop.eup %1557 }
 0x698   :  { %v787_v37 = vmul.f32 0.5, %v1558_v30 }
 0x69a   :  { %v788_v38 = vadd.f32 %v787_v37, %v785_v36 }
 0x69c   :  { %790 = vst [vmem:[#allocation10 + $0x30] sm:$0xff] %v788_v38  ;;  %1338 = vmatmul.mubr.f32.vlgmr.msra.gmra.mrb[14].mxu0 %v788_v38  ;;  %v864_v45 = vmul.f32 0.5, %v788_v38 }
 0x76f   :  { %v859_v41 = vpop.f32.mrb[14].mxu0 }
 0x770   :  { %v863_v42 = vadd.f32 %v859_v41, %v228_v39  ;;  %v1339_v43 = vpop.f32.mrb[15].mxu0 }
 0x772   :  { %1559 = vtanh.f32 %v863_v42 }
 0x77c   :  { %v1560_v44 = vpop.eup %1559 }
 0x77d   :  { %v866_v46 = vmul.f32 0.5, %v1560_v44 }
 0x77f   :  { %v867_v47 = vadd.f32 %v866_v46, %v864_v45 }
 0x781   :  { %869 = vst [vmem:[#allocation10 + $0x38] sm:$0xff] %v867_v47 }
 0x782   :  { %1638 = shalt.err (!%p1635_p0)
}
 0x783   :  { %s1639_s12 = scalar_lea.hbm %s1962_s5, 1024 }
 0x784   :  { %p1640_p1 = scmp.ne.s32.totalorder %s1962_s5, %s1639_s12  ;;  %p1643_p2 = scmp.lt.u32.totalorder %s1639_s12, %s1962_s5 }
 0x786   :  { %p1645_p3 = pnand %p1643_p2, %p1640_p1 }
 0x788   :  { %1648 = shalt.err (!%p1645_p3)
}
 0x789   :  { %882 = dma.vmem_to_hbm [thread:$0]  %s877_s8, 1024, %s1962_s5, [#allocation6], %s1657_s30, %s1657_s30, %s1658_s6  }
 0x78a   :  { %1653 = dma.done.wait [#allocation6], 1024  }
 0x78b   :  { %1654 = vsyncadd [#allocation6], 4294966272 }
 0x78c   :  { %886 = vsyncpa [#allocation5], 1 }
 0x78d   :  { %887 = vsyncpa [#allocation8], 1 }
 0x78e   :  { %888 = vsyncpa [#allocation6], 1 }

</bundles_post_ra>
